<compile_context>
chip_gen: v6e
topology: v6e:2x2x1
jax: 0.10.0
libtpu: 0.0.40
codegen_flags: <defaults>
</compile_context>

<pallas_src>
import functools

import jax
import jax.numpy as jnp
from jax.experimental import pallas as pl
from jax.experimental.pallas import tpu as pltpu


def _sap_kernel(x_ref, w_ref, b_ref, u_ref, o_ref, acc_ref, *, inv_m):
    # x_ref  : (1, C, tM, T)  mel-tile of one batch element (native dtype)
    # w_ref  : (C, C)         Linear weight, pre-scaled by 1/M in the wrapper
    # b_ref  : (C, 1)         Linear bias as a column
    # u_ref  : (C, 1)         attention vector u
    # o_ref  : (1, C, 1)      pooled output column for this batch element
    # acc_ref: (C, T) f32     running SUM over the mel axis
    mi = pl.program_id(1)

    # Partial mel-sum for this tile (accumulate in f32; cheap VPU adds).
    tile_sum = jnp.sum(x_ref[0].astype(jnp.float32), axis=1)        # (C, T)

    @pl.when(mi == 0)
    def _():
        acc_ref[...] = tile_sum          # first tile: plain store, no zero-fill RMW

    @pl.when(mi > 0)
    def _():
        acc_ref[...] += tile_sum

    @pl.when(mi == pl.num_programs(1) - 1)
    def _():
        acc = acc_ref[...]                                           # (C, T) f32 (sum, not mean)

        # h = tanh((W/M) @ acc + b); 1/M is already folded into W, so the mean
        # never needs its own (C, T) temporary.  MXU fed in W's dtype, f32 acc.
        h = jnp.tanh(
            jnp.dot(w_ref[...], acc.astype(w_ref.dtype),
                    preferred_element_type=jnp.float32)
            + b_ref[...].astype(jnp.float32)
        )                                                            # (C, T) f32

        # s = u^T h -> (1, T): VPU multiply + sublane reduce (no 1-row MXU matmul).
        s = jnp.sum(u_ref[...].astype(jnp.float32) * h, axis=0, keepdims=True)

        # Softmax over frames (lane axis).  Exact reciprocal: cost is hidden
        # under the x DMA and keeps the result close to the f32 reference.
        s = s - jnp.max(s, axis=-1, keepdims=True)
        p = jnp.exp(s)
        a = p * pl.reciprocal(jnp.sum(p, axis=-1, keepdims=True), approx=False)

        # e[c] = (1/M) * sum_t a[t] * acc[c, t]
        # VPU multiply + lane reduce; result stays in (C, 1) orientation so no
        # O(C*T) transpose (and no relayout) is needed for the store.
        e = jnp.sum(acc * a, axis=1, keepdims=True) * inv_m          # (C, 1) f32
        o_ref[0] = e.astype(o_ref.dtype)


def _vmem_capacity_bytes():
    """Generation-aware physical VMEM size (64 MiB on v7x, 128 MiB on v5e/v6e)."""
    try:
        return int(pltpu.get_tpu_info().vmem_capacity_bytes)
    except Exception:
        return 64 << 20  # conservative fallback (assume v7x)


def _pick_mel_tile(C, M, T, itemsize, budget_bytes):
    """Largest mel tile whose (C, tM, T) x-block fits the per-block VMEM budget.

    Prefer the whole mel axis (single contiguous HBM DMA).  Otherwise use a
    divisor of M that is a multiple of 8 (sublane-friendly); fall back to the
    smallest such divisor, or M itself if none exists.
    """
    def block_bytes(tm):
        return C * tm * T * itemsize

    if block_bytes(M) <= budget_bytes:
        return M
    cands = [d for d in range(8, M, 8) if M % d == 0]
    fitting = [d for d in cands if block_bytes(d) <= budget_bytes]
    if fitting:
        return max(fitting)
    if cands:
        return min(cands)
    return M


def self_attentive_pool2d(x, W, b, u, *, mel_tile=None, cast_weights_to_bf16=False):
    """x: [B, C, M, T]; W: [C, C]; b: [C]; u: [C, 1]  ->  [B, C]"""
    B, C, M, T = x.shape
    itemsize = jnp.dtype(x.dtype).itemsize
    inv_m = 1.0 / float(M)

    # Parameter glue (wrapper-side, one-time):
    #   * optionally cast f32 weights to bf16 for the MXU (off by default to
    #     preserve the f32 reference numerics),
    #   * fold 1/M into W so the kernel never materializes the (C, T) mean,
    #   * present bias / u as columns for the (C, T) orientation.
    W_k = W.astype(jnp.bfloat16) if (cast_weights_to_bf16 and W.dtype == jnp.float32) else W
    W_k = (W_k * inv_m).astype(W_k.dtype)
    b2 = b.reshape(C, 1)
    u2 = u.reshape(C, 1)

    # ---- generation-aware VMEM budgeting -----------------------------------
    cap = _vmem_capacity_bytes()
    # headroom for compiler-internal scratch: ~54 MiB usable on v7x, ~112 MiB on v5e/v6e.
    usable = min(cap - (10 << 20), (cap * 7) // 8)

    param_bytes = (C * C + 2 * C) * jnp.dtype(W_k.dtype).itemsize
    acc_bytes = C * T * 4                      # (C, T) f32 mel-sum scratch
    final_bytes = 2 * C * T * 4                # finalize temporaries (h f32 + casts)

    if mel_tile is None:
        # Largest double-buffered x tile that still leaves room for params,
        # scratch and finalize temporaries (prefers the whole-mel contiguous DMA).
        block_budget = max((usable - 2 * param_bytes - acc_bytes - final_bytes) // 2,
                           256 << 10)
        tM = _pick_mel_tile(C, M, T, itemsize, block_budget)
    else:
        tM = mel_tile
    assert M % tM == 0, "mel tile must divide n_mels"
    n_mel_tiles = M // tM

    x_block_bytes = C * tM * T * itemsize
    needed = 2 * x_block_bytes + 2 * param_bytes + acc_bytes + final_bytes + (4 << 20)
    vmem_limit = int(min(max(needed, 16 << 20), usable))

    kernel = functools.partial(_sap_kernel, inv_m=inv_m)

    def build(single_buffer_params):
        # Constant-index params never need a second pipeline buffer.
        pmode = {"pipeline_mode": pl.Buffered(1)} if single_buffer_params else {}
        grid_spec = pltpu.PrefetchScalarGridSpec(
            num_scalar_prefetch=0,
            grid=(B, n_mel_tiles),
            in_specs=[
                pl.BlockSpec((1, C, tM, T), lambda bi, mi: (bi, 0, mi, 0)),
                pl.BlockSpec((C, C), lambda bi, mi: (0, 0), **pmode),
                pl.BlockSpec((C, 1), lambda bi, mi: (0, 0), **pmode),
                pl.BlockSpec((C, 1), lambda bi, mi: (0, 0), **pmode),
            ],
            out_specs=pl.BlockSpec((1, C, 1), lambda bi, mi: (bi, 0, 0)),
            scratch_shapes=[pltpu.VMEM((C, T), jnp.float32)],
        )
        return pl.pallas_call(
            kernel,
            out_shape=jax.ShapeDtypeStruct((B, C, 1), x.dtype),
            grid_spec=grid_spec,
            compiler_params=pltpu.CompilerParams(
                dimension_semantics=("parallel", "arbitrary"),
                vmem_limit_bytes=vmem_limit,
            ),
        )

    try:
        out = build(True)(x, W_k, b2, u2)
    except Exception:
        # Fallback for jax versions without single-buffer pipeline_mode support.
        out = build(False)(x, W_k, b2, u2)

    return out.reshape(B, C)


def _reference(x, W, b, u):
    # Pure-JAX mirror of the PyTorch forward pass.
    xm = jnp.mean(x.astype(jnp.float32), axis=2)          # (B, C, T)
    xt = jnp.transpose(xm, (0, 2, 1))                      # (B, T, C)
    h = jnp.tanh(xt @ W.astype(jnp.float32).T + b.astype(jnp.float32))
    s = jnp.squeeze(h @ u.astype(jnp.float32), axis=2)     # (B, T)
    a = jax.nn.softmax(s, axis=1)                          # (B, T)
    return jnp.sum(xt * a[..., None], axis=1)              # (B, C)


if __name__ == "__main__":
    B, C, M, T = 2, 4, 16, 16   # batch, channels (input_dim), n_mels, frames
    key = jax.random.PRNGKey(0)
    kx, kw, kb, ku = jax.random.split(key, 4)

    x = jax.random.normal(kx, (B, C, M, T), dtype=jnp.float32)

    # Deterministic synthetic parameters with the shapes from __init__:
    #   nn.Linear(C, C): weight (C, C), bias (C,);  u: (C, 1) (xavier_normal-like)
    W = jax.random.normal(kw, (C, C), dtype=jnp.float32) * (1.0 / jnp.sqrt(C))
    b = jax.random.normal(kb, (C,), dtype=jnp.float32) * 0.1
    u = jax.random.normal(ku, (C, 1), dtype=jnp.float32) * jnp.sqrt(2.0 / (C + 1))

    ref = _reference(x, W, b, u)

    # Whole-mel (single contiguous DMA) fast path.
    out1 = jax.block_until_ready(self_attentive_pool2d(x, W, b, u))
    # mel_tile=8 exercises the multi-tile accumulation / finalize path (2 tiles).
    out2 = jax.block_until_ready(self_attentive_pool2d(x, W, b, u, mel_tile=8))

    assert out1.shape == (B, C) and out2.shape == (B, C)
    assert jnp.allclose(out1, ref, atol=2e-3, rtol=2e-3), (out1, ref)
    assert jnp.allclose(out2, ref, atol=2e-3, rtol=2e-3), (out2, ref)
    print("KERNEL_OK")
</pallas_src>

<mosaic_0001>
module attributes {stable_mosaic.version = 11 : i64} {
  func.func @_sap_kernel(%arg0: i32, %arg1: i32, %arg2: memref<1x4x16x16xf32, #tpu.memory_space<vmem>>, %arg3: memref<4x4xf32, #tpu.memory_space<vmem>>, %arg4: memref<4x1xf32, #tpu.memory_space<vmem>>, %arg5: memref<4x1xf32, #tpu.memory_space<vmem>>, %arg6: memref<1x4x1xf32, #tpu.memory_space<vmem>>, %arg7: memref<4x16xf32, #tpu.memory_space<vmem>>) attributes {dimension_semantics = [#tpu.dimension_semantics<parallel>, #tpu.dimension_semantics<arbitrary>], iteration_bounds = array<i64: 2, 1>, scalar_prefetch = 0 : i64, scratch_operands = 1 : i64, tpu.core_type = #tpu.core_type<tc>, window_params = [{transform_indices = @transform_0, window_bounds = array<i64: 1, 4, 16, 16>}, {pipeline_mode = #tpu.pipeline_mode<synchronous>, transform_indices = @transform_1, window_bounds = array<i64: 4, 4>}, {pipeline_mode = #tpu.pipeline_mode<synchronous>, transform_indices = @transform_2, window_bounds = array<i64: 4, 1>}, {pipeline_mode = #tpu.pipeline_mode<synchronous>, transform_indices = @transform_3, window_bounds = array<i64: 4, 1>}, {transform_indices = @transform_4, window_bounds = array<i64: 1, 4, 1>}]} {
    %c0 = arith.constant 0 : index
    %c0_0 = arith.constant 0 : index
    %c0_1 = arith.constant 0 : index
    %c0_2 = arith.constant 0 : index
    %0 = vector.load %arg2[%c0, %c0_0, %c0_1, %c0_2] : memref<1x4x16x16xf32, #tpu.memory_space<vmem>>, vector<1x4x16x16xf32>
    %1 = vector.shape_cast %0 : vector<1x4x16x16xf32> to vector<4x16x16xf32>
    %cst = arith.constant dense<0.000000e+00> : vector<4x16xf32>
    %2 = vector.multi_reduction <add>, %1, %cst [1] : vector<4x16x16xf32> to vector<4x16xf32>
    %c0_i32 = arith.constant 0 : i32
    %3 = arith.cmpi eq, %arg1, %c0_i32 : i32
    %4 = arith.extui %3 : i1 to i32
    %c0_i32_3 = arith.constant 0 : i32
    %5 = arith.cmpi ne, %4, %c0_i32_3 : i32
    scf.if %5 {
      %c0_8 = arith.constant 0 : index
      %c0_9 = arith.constant 0 : index
      %12 = vector.load %arg7[%c0_8, %c0_9] : memref<4x16xf32, #tpu.memory_space<vmem>>, vector<4x16xf32>
      tpu.vector_store %arg7[%c0_8, %c0_9], %2 {strides = array<i32>} : memref<4x16xf32, #tpu.memory_space<vmem>>, vector<4x16xf32>,
    } else {
    }
    %c0_i32_4 = arith.constant 0 : i32
    %6 = arith.cmpi sgt, %arg1, %c0_i32_4 : i32
    %7 = arith.extui %6 : i1 to i32
    %c0_i32_5 = arith.constant 0 : i32
    %8 = arith.cmpi ne, %7, %c0_i32_5 : i32
    scf.if %8 {
      %c0_8 = arith.constant 0 : index
      %c0_9 = arith.constant 0 : index
      %12 = vector.load %arg7[%c0_8, %c0_9] : memref<4x16xf32, #tpu.memory_space<vmem>>, vector<4x16xf32>
      %13 = arith.addf %12, %2 : vector<4x16xf32>
      %c0_10 = arith.constant 0 : index
      %c0_11 = arith.constant 0 : index
      %14 = vector.load %arg7[%c0_10, %c0_11] : memref<4x16xf32, #tpu.memory_space<vmem>>, vector<4x16xf32>
      tpu.vector_store %arg7[%c0_10, %c0_11], %13 {strides = array<i32>} : memref<4x16xf32, #tpu.memory_space<vmem>>, vector<4x16xf32>,
    } else {
    }
    %c0_i32_6 = arith.constant 0 : i32
    %9 = arith.cmpi eq, %arg1, %c0_i32_6 : i32
    %10 = arith.extui %9 : i1 to i32
    %c0_i32_7 = arith.constant 0 : i32
    %11 = arith.cmpi ne, %10, %c0_i32_7 : i32
    scf.if %11 {
      %c0_8 = arith.constant 0 : index
      %c0_9 = arith.constant 0 : index
      %12 = vector.load %arg7[%c0_8, %c0_9] : memref<4x16xf32, #tpu.memory_space<vmem>>, vector<4x16xf32>
      %c0_10 = arith.constant 0 : index
      %c0_11 = arith.constant 0 : index
      %13 = vector.load %arg3[%c0_10, %c0_11] : memref<4x4xf32, #tpu.memory_space<vmem>>, vector<4x4xf32>
      %cst_12 = arith.constant dense<0.000000e+00> : vector<4x16xf32>
      %14 = tpu.matmul %13, %12, %cst_12 {dimension_numbers = #tpu.dot_dimension_numbers<[1], [0], [0], [1], [0, 0, 1, 1], [], []>} : vector<4x4xf32>, vector<4x16xf32>, vector<4x16xf32> -> vector<4x16xf32>
      %c0_13 = arith.constant 0 : index
      %c0_14 = arith.constant 0 : index
      %15 = vector.load %arg4[%c0_13, %c0_14] : memref<4x1xf32, #tpu.memory_space<vmem>>, vector<4x1xf32>
      %16 = vector.broadcast %15 : vector<4x1xf32> to vector<4x16xf32>
      %17 = arith.addf %14, %16 : vector<4x16xf32>
      %18 = math.tanh %17 : vector<4x16xf32>
      %c0_15 = arith.constant 0 : index
      %c0_16 = arith.constant 0 : index
      %19 = vector.load %arg5[%c0_15, %c0_16] : memref<4x1xf32, #tpu.memory_space<vmem>>, vector<4x1xf32>
      %20 = vector.broadcast %19 : vector<4x1xf32> to vector<4x16xf32>
      %21 = arith.mulf %20, %18 : vector<4x16xf32>
      %cst_17 = arith.constant dense<0.000000e+00> : vector<16xf32>
      %22 = vector.multi_reduction <add>, %21, %cst_17 [0] : vector<4x16xf32> to vector<16xf32>
      %23 = vector.shape_cast %22 : vector<16xf32> to vector<1x16xf32>
      %cst_18 = arith.constant dense<0xFF800000> : vector<1xf32>
      %24 = vector.multi_reduction <maximumf>, %23, %cst_18 [1] : vector<1x16xf32> to vector<1xf32>
      %25 = vector.shape_cast %24 : vector<1xf32> to vector<1x1xf32>
      %26 = vector.broadcast %25 : vector<1x1xf32> to vector<1x16xf32>
      %27 = arith.subf %23, %26 : vector<1x16xf32>
      %28 = math.exp %27 : vector<1x16xf32>
      %cst_19 = arith.constant dense<0.000000e+00> : vector<1xf32>
      %29 = vector.multi_reduction <add>, %28, %cst_19 [1] : vector<1x16xf32> to vector<1xf32>
      %30 = vector.shape_cast %29 : vector<1xf32> to vector<1x1xf32>
      %31 = tpu.reciprocal %30 : vector<1x1xf32> -> vector<1x1xf32>
      %32 = vector.broadcast %31 : vector<1x1xf32> to vector<1x16xf32>
      %33 = arith.mulf %28, %32 : vector<1x16xf32>
      %34 = vector.broadcast %33 : vector<1x16xf32> to vector<4x16xf32>
      %35 = arith.mulf %12, %34 : vector<4x16xf32>
      %cst_20 = arith.constant dense<0.000000e+00> : vector<4xf32>
      %36 = vector.multi_reduction <add>, %35, %cst_20 [1] : vector<4x16xf32> to vector<4xf32>
      %37 = vector.shape_cast %36 : vector<4xf32> to vector<4x1xf32>
      %cst_21 = arith.constant 6.250000e-02 : f32
      %38 = vector.broadcast %cst_21 : f32 to vector<4x1xf32>
      %39 = arith.mulf %37, %38 : vector<4x1xf32>
      %c0_22 = arith.constant 0 : index
      %c0_23 = arith.constant 0 : index
      %c0_24 = arith.constant 0 : index
      %40 = vector.load %arg6[%c0_22, %c0_23, %c0_24] : memref<1x4x1xf32, #tpu.memory_space<vmem>>, vector<1x4x1xf32>
      %41 = vector.shape_cast %40 : vector<1x4x1xf32> to vector<4x1xf32>
      %42 = vector.shape_cast %39 : vector<4x1xf32> to vector<1x4x1xf32>
      tpu.vector_store %arg6[%c0_22, %c0_23, %c0_24], %42 {strides = array<i32>} : memref<1x4x1xf32, #tpu.memory_space<vmem>>, vector<1x4x1xf32>,
    } else {
    }
    return
  }
  func.func @transform_0(%arg0: i32, %arg1: i32) -> (i32, i32, i32, i32) {
    %c0_i32 = arith.constant 0 : i32
    %c0_i32_0 = arith.constant 0 : i32
    %c0_i32_1 = arith.constant 0 : i32
    return %arg0, %c0_i32, %arg1, %c0_i32_0 : i32, i32, i32, i32
  }
  func.func @transform_1(%arg0: i32, %arg1: i32) -> (i32, i32) {
    %c0_i32 = arith.constant 0 : i32
    %c0_i32_0 = arith.constant 0 : i32
    %c0_i32_1 = arith.constant 0 : i32
    return %c0_i32, %c0_i32_0 : i32, i32
  }
  func.func @transform_2(%arg0: i32, %arg1: i32) -> (i32, i32) {
    %c0_i32 = arith.constant 0 : i32
    %c0_i32_0 = arith.constant 0 : i32
    %c0_i32_1 = arith.constant 0 : i32
    return %c0_i32, %c0_i32_0 : i32, i32
  }
  func.func @transform_3(%arg0: i32, %arg1: i32) -> (i32, i32) {
    %c0_i32 = arith.constant 0 : i32
    %c0_i32_0 = arith.constant 0 : i32
    %c0_i32_1 = arith.constant 0 : i32
    return %c0_i32, %c0_i32_0 : i32, i32
  }
  func.func @transform_4(%arg0: i32, %arg1: i32) -> (i32, i32, i32) {
    %c0_i32 = arith.constant 0 : i32
    %c0_i32_0 = arith.constant 0 : i32
    %c0_i32_1 = arith.constant 0 : i32
    return %arg0, %c0_i32, %c0_i32_0 : i32, i32, i32
  }
}

module attributes {stable_mosaic.version = 11 : i64} {
  func.func @_sap_kernel(%arg0: i32, %arg1: i32, %arg2: memref<1x4x16x16xf32, #tpu.memory_space<vmem>>, %arg3: memref<4x4xf32, #tpu.memory_space<vmem>>, %arg4: memref<4x1xf32, #tpu.memory_space<vmem>>, %arg5: memref<4x1xf32, #tpu.memory_space<vmem>>, %arg6: memref<1x4x1xf32, #tpu.memory_space<vmem>>, %arg7: memref<4x16xf32, #tpu.memory_space<vmem>>) attributes {dimension_semantics = [#tpu.dimension_semantics<parallel>, #tpu.dimension_semantics<arbitrary>], iteration_bounds = array<i64: 2, 1>, scalar_prefetch = 0 : i64, scratch_operands = 1 : i64, tpu.core_type = #tpu.core_type<tc>, window_params = [{transform_indices = @transform_0, window_bounds = array<i64: 1, 4, 16, 16>}, {pipeline_mode = #tpu.pipeline_mode<synchronous>, transform_indices = @transform_1, window_bounds = array<i64: 4, 4>}, {pipeline_mode = #tpu.pipeline_mode<synchronous>, transform_indices = @transform_2, window_bounds = array<i64: 4, 1>}, {pipeline_mode = #tpu.pipeline_mode<synchronous>, transform_indices = @transform_3, window_bounds = array<i64: 4, 1>}, {transform_indices = @transform_4, window_bounds = array<i64: 1, 4, 1>}]} {
    %c0 = arith.constant 0 : index
    %c0_0 = arith.constant 0 : index
    %c0_1 = arith.constant 0 : index
    %c0_2 = arith.constant 0 : index
    %0 = vector.load %arg2[%c0, %c0_0, %c0_1, %c0_2] : memref<1x4x16x16xf32, #tpu.memory_space<vmem>>, vector<1x4x16x16xf32>
    %1 = vector.shape_cast %0 : vector<1x4x16x16xf32> to vector<4x16x16xf32>
    %cst = arith.constant dense<0.000000e+00> : vector<4x16xf32>
    %2 = vector.multi_reduction <add>, %1, %cst [1] : vector<4x16x16xf32> to vector<4x16xf32>
    %c0_i32 = arith.constant 0 : i32
    %3 = arith.cmpi eq, %arg1, %c0_i32 : i32
    %4 = arith.extui %3 : i1 to i32
    %c0_i32_3 = arith.constant 0 : i32
    %5 = arith.cmpi ne, %4, %c0_i32_3 : i32
    scf.if %5 {
      %c0_8 = arith.constant 0 : index
      %c0_9 = arith.constant 0 : index
      %12 = vector.load %arg7[%c0_8, %c0_9] : memref<4x16xf32, #tpu.memory_space<vmem>>, vector<4x16xf32>
      tpu.vector_store %arg7[%c0_8, %c0_9], %2 {strides = array<i32>} : memref<4x16xf32, #tpu.memory_space<vmem>>, vector<4x16xf32>,
    } else {
    }
    %c0_i32_4 = arith.constant 0 : i32
    %6 = arith.cmpi sgt, %arg1, %c0_i32_4 : i32
    %7 = arith.extui %6 : i1 to i32
    %c0_i32_5 = arith.constant 0 : i32
    %8 = arith.cmpi ne, %7, %c0_i32_5 : i32
    scf.if %8 {
      %c0_8 = arith.constant 0 : index
      %c0_9 = arith.constant 0 : index
      %12 = vector.load %arg7[%c0_8, %c0_9] : memref<4x16xf32, #tpu.memory_space<vmem>>, vector<4x16xf32>
      %13 = arith.addf %12, %2 : vector<4x16xf32>
      %c0_10 = arith.constant 0 : index
      %c0_11 = arith.constant 0 : index
      %14 = vector.load %arg7[%c0_10, %c0_11] : memref<4x16xf32, #tpu.memory_space<vmem>>, vector<4x16xf32>
      tpu.vector_store %arg7[%c0_10, %c0_11], %13 {strides = array<i32>} : memref<4x16xf32, #tpu.memory_space<vmem>>, vector<4x16xf32>,
    } else {
    }
    %c0_i32_6 = arith.constant 0 : i32
    %9 = arith.cmpi eq, %arg1, %c0_i32_6 : i32
    %10 = arith.extui %9 : i1 to i32
    %c0_i32_7 = arith.constant 0 : i32
    %11 = arith.cmpi ne, %10, %c0_i32_7 : i32
    scf.if %11 {
      %c0_8 = arith.constant 0 : index
      %c0_9 = arith.constant 0 : index
      %12 = vector.load %arg7[%c0_8, %c0_9] : memref<4x16xf32, #tpu.memory_space<vmem>>, vector<4x16xf32>
      %c0_10 = arith.constant 0 : index
      %c0_11 = arith.constant 0 : index
      %13 = vector.load %arg3[%c0_10, %c0_11] : memref<4x4xf32, #tpu.memory_space<vmem>>, vector<4x4xf32>
      %cst_12 = arith.constant dense<0.000000e+00> : vector<4x16xf32>
      %14 = tpu.matmul %13, %12, %cst_12 {dimension_numbers = #tpu.dot_dimension_numbers<[1], [0], [0], [1], [0, 0, 1, 1], [], []>} : vector<4x4xf32>, vector<4x16xf32>, vector<4x16xf32> -> vector<4x16xf32>
      %c0_13 = arith.constant 0 : index
      %c0_14 = arith.constant 0 : index
      %15 = vector.load %arg4[%c0_13, %c0_14] : memref<4x1xf32, #tpu.memory_space<vmem>>, vector<4x1xf32>
      %16 = vector.broadcast %15 : vector<4x1xf32> to vector<4x16xf32>
      %17 = arith.addf %14, %16 : vector<4x16xf32>
      %18 = math.tanh %17 : vector<4x16xf32>
      %c0_15 = arith.constant 0 : index
      %c0_16 = arith.constant 0 : index
      %19 = vector.load %arg5[%c0_15, %c0_16] : memref<4x1xf32, #tpu.memory_space<vmem>>, vector<4x1xf32>
      %20 = vector.broadcast %19 : vector<4x1xf32> to vector<4x16xf32>
      %21 = arith.mulf %20, %18 : vector<4x16xf32>
      %cst_17 = arith.constant dense<0.000000e+00> : vector<16xf32>
      %22 = vector.multi_reduction <add>, %21, %cst_17 [0] : vector<4x16xf32> to vector<16xf32>
      %23 = vector.shape_cast %22 : vector<16xf32> to vector<1x16xf32>
      %cst_18 = arith.constant dense<0xFF800000> : vector<1xf32>
      %24 = vector.multi_reduction <maximumf>, %23, %cst_18 [1] : vector<1x16xf32> to vector<1xf32>
      %25 = vector.shape_cast %24 : vector<1xf32> to vector<1x1xf32>
      %26 = vector.broadcast %25 : vector<1x1xf32> to vector<1x16xf32>
      %27 = arith.subf %23, %26 : vector<1x16xf32>
      %28 = math.exp %27 : vector<1x16xf32>
      %cst_19 = arith.constant dense<0.000000e+00> : vector<1xf32>
      %29 = vector.multi_reduction <add>, %28, %cst_19 [1] : vector<1x16xf32> to vector<1xf32>
      %30 = vector.shape_cast %29 : vector<1xf32> to vector<1x1xf32>
      %31 = tpu.reciprocal %30 : vector<1x1xf32> -> vector<1x1xf32>
      %32 = vector.broadcast %31 : vector<1x1xf32> to vector<1x16xf32>
      %33 = arith.mulf %28, %32 : vector<1x16xf32>
      %34 = vector.broadcast %33 : vector<1x16xf32> to vector<4x16xf32>
      %35 = arith.mulf %12, %34 : vector<4x16xf32>
      %cst_20 = arith.constant dense<0.000000e+00> : vector<4xf32>
      %36 = vector.multi_reduction <add>, %35, %cst_20 [1] : vector<4x16xf32> to vector<4xf32>
      %37 = vector.shape_cast %36 : vector<4xf32> to vector<4x1xf32>
      %cst_21 = arith.constant 6.250000e-02 : f32
      %38 = vector.broadcast %cst_21 : f32 to vector<4x1xf32>
      %39 = arith.mulf %37, %38 : vector<4x1xf32>
      %c0_22 = arith.constant 0 : index
      %c0_23 = arith.constant 0 : index
      %c0_24 = arith.constant 0 : index
      %40 = vector.load %arg6[%c0_22, %c0_23, %c0_24] : memref<1x4x1xf32, #tpu.memory_space<vmem>>, vector<1x4x1xf32>
      %41 = vector.shape_cast %40 : vector<1x4x1xf32> to vector<4x1xf32>
      %42 = vector.shape_cast %39 : vector<4x1xf32> to vector<1x4x1xf32>
      tpu.vector_store %arg6[%c0_22, %c0_23, %c0_24], %42 {strides = array<i32>} : memref<1x4x1xf32, #tpu.memory_space<vmem>>, vector<1x4x1xf32>,
    } else {
    }
    return
  }
  func.func @transform_0(%arg0: i32, %arg1: i32) -> (i32, i32, i32, i32) {
    %c0_i32 = arith.constant 0 : i32
    %c0_i32_0 = arith.constant 0 : i32
    %c0_i32_1 = arith.constant 0 : i32
    return %arg0, %c0_i32, %arg1, %c0_i32_0 : i32, i32, i32, i32
  }
  func.func @transform_1(%arg0: i32, %arg1: i32) -> (i32, i32) {
    %c0_i32 = arith.constant 0 : i32
    %c0_i32_0 = arith.constant 0 : i32
    %c0_i32_1 = arith.constant 0 : i32
    return %c0_i32, %c0_i32_0 : i32, i32
  }
  func.func @transform_2(%arg0: i32, %arg1: i32) -> (i32, i32) {
    %c0_i32 = arith.constant 0 : i32
    %c0_i32_0 = arith.constant 0 : i32
    %c0_i32_1 = arith.constant 0 : i32
    return %c0_i32, %c0_i32_0 : i32, i32
  }
  func.func @transform_3(%arg0: i32, %arg1: i32) -> (i32, i32) {
    %c0_i32 = arith.constant 0 : i32
    %c0_i32_0 = arith.constant 0 : i32
    %c0_i32_1 = arith.constant 0 : i32
    return %c0_i32, %c0_i32_0 : i32, i32
  }
  func.func @transform_4(%arg0: i32, %arg1: i32) -> (i32, i32, i32) {
    %c0_i32 = arith.constant 0 : i32
    %c0_i32_0 = arith.constant 0 : i32
    %c0_i32_1 = arith.constant 0 : i32
    return %arg0, %c0_i32, %c0_i32_0 : i32, i32, i32
  }
}

</mosaic_0001>

<bundles_post_ra>
// kernel: tpu_custom_call.1
= control target key start
LH: loop header
LB: loop body
LE: loop exit
PB: predicated region body
PF: predicated region fallthrough
CT: control target
= control target key end

     0   :  { %9 = vsyncpa [#allocation4], 0  ;;  %s831_s0 = inlined_call_operand.hbm [shape: f32[2,4,16,16], index: 0, kind: input, shape index: {}]   ;;  %s832_s1 = inlined_call_operand.vmem [shape: f32[4,4], index: 1, kind: input, shape index: {}]   ;;  %s833_s2 = inlined_call_operand.vmem [shape: f32[4,1], index: 2, kind: input, shape index: {}]   ;;  %s834_s3 = inlined_call_operand.vmem [shape: f32[4,1], index: 3, kind: input, shape index: {}]   ;;  %s835_s4 = inlined_call_operand.vmem [shape: f32[2,4,1], index: 4, kind: output, shape index: {}]  }
   0x1   :  { %11 = vsyncpa [#allocation4 + $0x1], 0  ;;  %s713_s15 = smov 0   ;;  %s715_s16 = smov 0  }
   0x2   :  { %s717_s17 = smov 0   ;;  %s719_s18 = smov 0  }
   0x3   :  { %s721_s19 = smov 0   ;;  %s723_s20 = smov 0  }
   0x4 LB: > { %s513_s21 = sadd.s32 4294967295, %s680_s20   ;;  %s29_s22 = sadd.s32 1, %s676_s19  ;;  %s680_s20 = sphi %s723_s20, %s17_s20   ;;  %s676_s19 = sphi %s721_s19, %s843_s19   ;;  %s672_s18 = sphi %s719_s18, %s842_s18   ;;  %s668_s17 = sphi %s717_s17, %s841_s17   ;;  %s664_s16 = sphi %s715_s16, %s840_s16   ;;  %s660_s15 = sphi %s713_s15, %s839_s15  }
   0x5   : > { %p31_p0 = scmp.ge.s32.totalorder %s29_s22, 2  ;;  %s38_s23 = sadd.s32 1, %s668_s17 }
   0x6   : > { %p45_p1 = scmp.ne.s32.totalorder %s668_s17, %s664_s16  ;;  %p46_p2 = scmp.eq.s32.totalorder %s680_s20, 0 }
   0x7   : > { %s845_s22 = smov (%p31_p0, %s29_s22), 0  ;;  %p51_p4 = scmp.ne.s32.totalorder %s664_s16, %s660_s15 }
   0x8   : > { %p749_p3 = por %p46_p2, %p45_p1  ;;  %s33_s25 = ssub.s32 %s676_s19, %s845_s22 }
   0x9   : > { %p52_p5 = scmp.eq.s32.totalorder %s513_s21, 0  ;;  %p36_p6 = scmp.eq.s32.totalorder %s33_s25, 0 }
   0xa   : > { %p541_p8 = scmp.lt.s32.totalorder %s680_s20, 2  ;;  %s173_s28 = sand.u32 1, %s668_s17  }
   0xb   : > { %p756_p7 = por %p52_p5, %p51_p4  ;;  %s527_s29 = sshll.u32 %s676_s19, 10 }
   0xc   : > { %s762_s27 = scalar_select %p36_p6, %s668_s17, %s38_s23  }
   0xd   : > { %s517_s30 = sshll.u32 %s173_s28, 6  ;;  %s185_s7 = scalar_lea.hbm %s831_s0, %s527_s29 }
   0xe   : > { %s177_s8 = scalar_lea.vmem [#allocation3], %s517_s30  ;;  %p771_p9 = pnand %p541_p8, %p749_p3 }
   0xf   : > { %s186_s9 = sshll.u32 %s177_s8, 4  ;;  %s174_s11 = scalar_lea.sflag [#allocation4], %s173_s28  ;;  %s187_s9 = int_to_ptr.vmem [resolvable:$true] %s186_s9 }
  0x10   : > { %p604_p10 = pneg %p771_p9  ;;  %s615_s12 = scalar_lea.vmem %s187_s9, 1024 }
  0x11   : > { %p616_p11 = scmp.ne.s32.totalorder %s187_s9, %s615_s12  ;;  %s682_s13 = smov [#allocation3]  }
  0x12   : > { %s620_s14 = sshll.u32 %s682_s13, 4  ;;  %s621_s14 = int_to_ptr.vmem [resolvable:$false] %s620_s14 }
  0x13   : > { %p618_p12 = pnand %p616_p11, %p604_p10  ;;  %s622_s15 = scalar_lea.vmem %s621_s14, 2048 }
  0x14   : > { %p623_p0 = scmp.lt.s32.totalorder %s187_s9, %s621_s14  ;;  %p624_p1 = scmp.lt.s32.totalorder %s622_s15, %s615_s12 }
  0x15   : > { %p619_p13 = pneg %p618_p12 }
  0x16   : > { %p625_p2 = por %p624_p1, %p623_p0 }
  0x18   : > { %p626_p3 = pnand %p625_p2, %p619_p13 }
  0x1a   : > { %629 = shalt.err (!%p626_p3)
}
  0x1b   : > { %s683_s21 = smov 128   ;;  %s684_s23 = smov 8  }
  0x1c   : > { %540 = dma.hbm_to_vmem [thread:$0]  (!%p771_p9), %s185_s7, 1024, %s187_s9, %s174_s11, %s683_s21, %s683_s21, %s684_s23  }
  0x1d   : > { %p520_p4 = scmp.ge.s32.totalorder %s680_s20, 1  ;;  %p194_p5 = scmp.lt.s32.totalorder %s680_s20, 3 }
  0x1f   : > { %p195_p6 = pnand %p520_p4, %p194_p5 }
  0x20   : > { %s200_s24 = sand.u32 (!%p195_p6), 1, %s664_s16  }
  0x21   : > { %198 = sbr.rel (%p195_p6) target bundleno = 748 (0x2ec), region = 36  ;;  %s521_s25 = sshll.u32 (!%p195_p6), %s200_s24, 6 }
  0x22   : > { %s201_s28 = scalar_lea.sflag (!%p195_p6), [#allocation4], %s200_s24  ;;  %s204_s29 = scalar_lea.vmem (!%p195_p6), [#allocation3], %s521_s25 }
  0x26   : > { %655 = dma.done.wait (%p756_p7), %s201_s28, 1024  }
  0x27   : > { %657 = vsyncadd (%p756_p7), %s201_s28, 4294966272  ;;  %v685_v0 = vmov 0.0   ;;  %vm686_vm0 = vmmov 0   ;;  %v687_v1 = vmov 0   ;;  %vm241_vm1 = vcmask 130048   ;;  %v233_v2 = vld [vmem:[%s204_s29] sm:$0xff] }
  0x28   : > { %530 = vmatprep.subr.mxu0 %v685_v0  ;;  %532 = vmatprep.mubr.msk.f32.mxu0 %vm686_vm0, %v685_v0  ;;  %v234_v3 = vld [vmem:[%s204_s29 + $0x8] sm:$0xff]  ;;  %v235_v4 = vld [vmem:[%s204_s29 + $0x10] sm:$0xff]  ;;  %v236_v5 = vld [vmem:[%s204_s29 + $0x18] sm:$0xff]  ;;  %v242_v8 = vsel %vm241_vm1, %v233_v2, 0.0  ;;  %vm286_vm2 = vcmask 1041409   ;;  %vm288_vm3 = vcmask 1042434  }
  0x29   : > { %595 = vset.pattern.permute.xlu0 %v687_v1  ;;  %v237_v6 = vld [vmem:[%s204_s29 + $0x20] sm:$0xff]  ;;  %v238_v7 = vld [vmem:[%s204_s29 + $0x28] sm:$0xff]  ;;  %v243_v9 = vsel %vm241_vm1, %v234_v3, 0.0  ;;  %v251_v10 = vsel %vm241_vm1, %v235_v4, 0.0  ;;  %v239_v11 = vld [vmem:[%s204_s29 + $0x30] sm:$0xff]  ;;  %v252_v14 = vsel %vm241_vm1, %v236_v5, 0.0 }
  0x2a   : > { %v240_v12 = vld [vmem:[%s204_s29 + $0x38] sm:$0xff]  ;;  %v244_v13 = vadd.f32 %v243_v9, %v242_v8  ;;  %v260_v15 = vsel %vm241_vm1, %v237_v6, 0.0  ;;  %v261_v16 = vsel %vm241_vm1, %v238_v7, 0.0  ;;  %v253_v17 = vadd.f32 %v252_v14, %v251_v10  ;;  %p229_p7 = scmp.lt.s32.totalorder %s672_s18, 1 }
  0x2b   : > { %v262_v18 = vadd.f32 %v261_v16, %v260_v15  ;;  %v269_v19 = vsel %vm241_vm1, %v239_v11, 0.0  ;;  %v270_v20 = vsel %vm241_vm1, %v240_v12, 0.0  ;;  %v319_v21 = vld [vmem:[%s833_s2] sm:$0xf]  ;;  %vm290_vm4 = vcmask 1043459  }
  0x2c   : > { %v245_v22 = vrot.slane %v244_v13, 4  ;;  %v271_v23 = vadd.f32 %v270_v20, %v269_v19  ;;  %322 = vperm.xlu0 %595, %v319_v21   ;;  %v254_v24 = vrot.slane %v253_v17, 4  ;;  %v404_v26 = vld [vmem:[%s834_s3] sm:$0xf]  ;;  %vm293_vm5 = vcmask 125952   ;;  %s847_s18 = smov (!%p229_p7, %s672_s18), 1 }
  0x2d   : > { %v263_v25 = vrot.slane %v262_v18, 4  ;;  %vm329_vm6 = vcmask 1043456   ;;  %v318_v51 = vld [vmem:[%s832_s1] sm:$0xf]  ;;  %vm325_vm7 = vcmask 31744   ;;  %s522_s9 = sshll.u32 %s847_s18, 2 }
  0x2e   : > { %v246_v27 = vadd.f32 %v245_v22, %v244_v13  ;;  %v272_v28 = vrot.slane %v271_v23, 4  ;;  %v255_v29 = vadd.f32 %v254_v24, %v253_v17  ;;  %s232_s12 = scalar_lea.vmem %s835_s4, %s522_s9  ;;  %vm435_vm8 = vcmask 3072  }
  0x2f   : > { %v264_v30 = vadd.f32 %v263_v25, %v262_v18 }
  0x30   : > { %v247_v31 = vrot.slane %v246_v27, 2  ;;  %v273_v32 = vadd.f32 %v272_v28, %v271_v23  ;;  %407 = vperm.xlu0 %595, %v404_v26   ;;  %v256_v33 = vrot.slane %v255_v29, 2 }
  0x31   : > { %v265_v34 = vrot.slane %v264_v30, 2 }
  0x32   : > { %v248_v35 = vadd.f32 %v247_v31, %v246_v27  ;;  %v274_v36 = vrot.slane %v273_v32, 2  ;;  %v257_v37 = vadd.f32 %v256_v33, %v255_v29 }
  0x33   : > { %v266_v38 = vadd.f32 %v265_v34, %v264_v30 }
  0x34   : > { %v249_v39 = vrot.slane %v248_v35, 1  ;;  %v275_v40 = vadd.f32 %v274_v36, %v273_v32  ;;  %v258_v41 = vrot.slane %v257_v37, 1 }
  0x35   : > { %v267_v42 = vrot.slane %v266_v38, 1 }
  0x36   : > { %v250_v43 = vadd.f32 %v249_v39, %v248_v35  ;;  %v276_v44 = vrot.slane %v275_v40, 1  ;;  %v259_v45 = vadd.f32 %v258_v41, %v257_v37 }
  0x37   : > { %v268_v46 = vadd.f32 %v267_v42, %v266_v38 }
  0x38   : > { %v277_v47 = vadd.f32 %v276_v44, %v275_v40  ;;  %v287_v48 = vsel %vm286_vm2, %v259_v45, %v250_v43 }
  0x39   : > { %v289_v49 = vsel %vm288_vm3, %v268_v46, %v287_v48 }
  0x3a   : > { %v291_v50 = vsel %vm290_vm4, %v277_v47, %v289_v49 }
  0x3b   : > { %294 = vst.msk [vmem:[#allocation2] sm:$0xf] %vm293_vm5, %v291_v50 }
  0x42   : > { %v317_v52 = vld [vmem:[#allocation2] sm:$0xf] }
  0x43   : > { %531 = vmatpush3.msk.msra.mxu0 %vm329_vm6, %v317_v52 }
  0x44   : > { %533 = vmatmul.mubr.msk.f32.vlgmr.msra.gmra.mxu0 %vm325_vm7, %v318_v51 }
  0xa7   : > { %v323_v53 = vpop.permute.xlu0 %322 }
  0xab   : > { %v408_v58 = vpop.permute.xlu0 %407 }
 0x104   : > { %v399_v54 = vpop.f32.mrf.mxu0 }
 0x105   : > { %v400_v55 = vadd.f32 %v399_v54, %v323_v53 }
 0x106   : > { %v534_v56 = vpop.f32.mrf.mxu0 }
 0x107   : > { %596 = vtanh.f32 %v400_v55 }
 0x114   : > { %v597_v57 = vpop.eup %596 }
 0x115   : > { %v410_v59 = vmul.f32 %v597_v57, %v408_v58 }
 0x117   : > { %v412_v60 = vsel %vm293_vm5, %v410_v59, 0.0 }
 0x118   : > { %v413_v61 = vrot.slane %v412_v60, 4 }
 0x11a   : > { %v414_v62 = vadd.f32 %v413_v61, %v412_v60 }
 0x11c   : > { %v415_v63 = vrot.slane %v414_v62, 2 }
 0x11e   : > { %v416_v0 = vadd.f32 %v415_v63, %v414_v62 }
 0x120   : > { %v417_v1 = vrot.slane %v416_v0, 1 }
 0x122   : > { %v418_v2 = vadd.f32 %v417_v1, %v416_v0 }
 0x124   : > { %v419_v3 = vsel %vm241_vm1, %v418_v2, -inf }
 0x125   : > { %420 = vmax.xlane.f32.xlu1 %v419_v3 }
 0x1ae   : > { %v421_v4 = vpop.xlane.xlu1 %420 }
 0x1af   : > { %v422_v5 = vsub.f32 %v418_v2, %v421_v4 }
 0x1b1   : > { %v423_v6 = vmul.f32 1.442695, %v422_v5 }
 0x1b3   : > { %598 = vpow2.f32 %v423_v6 }
 0x1c0   : > { %v599_v7 = vpop.eup %598 }
 0x1c1   : > { %v425_v8 = vsel %vm241_vm1, %v599_v7, 0.0 }
 0x1c2   : > { %426 = vadd.xlane.f32.xlu1 %v425_v8 }
 0x24b   : > { %v427_v9 = vpop.xlane.xlu1 %426 }
 0x24c   : > { %600 = vrcp.f32 %v427_v9 }
 0x259   : > { %v601_v10 = vpop.eup %600 }
 0x25a   : > { %v429_v11 = vmul.f32 %v601_v10, %v599_v7 }
 0x25c   : > { %v430_v12 = vmul.f32 %v429_v11, %v317_v52 }
 0x25e   : > { %v431_v13 = vsel %vm293_vm5, %v430_v12, 0.0 }
 0x25f   : > { %432 = vadd.xlane.f32.xlu0 %v431_v13 }
 0x2e8   : > { %v433_v14 = vpop.xlane.xlu0 %432 }
 0x2e9   : > { %v434_v15 = vmul.f32 0.0625, %v433_v14 }
 0x2eb   : > { %436 = vst.msk [vmem:[%s232_s12] sm:$0xf] %vm435_vm8, %v434_v15 }
 0x2ec PF: > { %s17_s20 = sadd.s32 1, %s680_s20   ;;  %s839_s15 = smov %s664_s16 }
 0x2ed   : > { %p14_p8 = scmp.ge.s32.totalorder %s17_s20, 4   ;;  %s840_s16 = smov %s668_s17 }
 0x2ee   : > { %s841_s17 = smov %s762_s27  ;;  %s842_s18 = smov %s676_s19 }
 0x2ef   : > { %s843_s19 = smov %s845_s22  ;;  %16 = sbr.rel (!%p14_p8) target bundleno = 4 (0x4), region = 88 }
 0x2f4   :  { %456 = vsyncpa [#allocation4], 1 }
 0x2f5   :  { %458 = vsyncpa [#allocation4 + $0x1], 1 }

// kernel: tpu_custom_call.1
= control target key start
LH: loop header
LB: loop body
LE: loop exit
PB: predicated region body
PF: predicated region fallthrough
CT: control target
= control target key end

     0   :  { %9 = vsyncpa [#allocation4], 0  ;;  %s831_s0 = inlined_call_operand.hbm [shape: f32[2,4,16,16], index: 0, kind: input, shape index: {}]   ;;  %s832_s1 = inlined_call_operand.vmem [shape: f32[4,4], index: 1, kind: input, shape index: {}]   ;;  %s833_s2 = inlined_call_operand.vmem [shape: f32[4,1], index: 2, kind: input, shape index: {}]   ;;  %s834_s3 = inlined_call_operand.vmem [shape: f32[4,1], index: 3, kind: input, shape index: {}]   ;;  %s835_s4 = inlined_call_operand.vmem [shape: f32[2,4,1], index: 4, kind: output, shape index: {}]  }
   0x1   :  { %11 = vsyncpa [#allocation4 + $0x1], 0  ;;  %s713_s15 = smov 0   ;;  %s715_s16 = smov 0  }
   0x2   :  { %s717_s17 = smov 0   ;;  %s719_s18 = smov 0  }
   0x3   :  { %s721_s19 = smov 0   ;;  %s723_s20 = smov 0  }
   0x4 LB: > { %s513_s21 = sadd.s32 4294967295, %s680_s20   ;;  %s29_s22 = sadd.s32 1, %s676_s19  ;;  %s680_s20 = sphi %s723_s20, %s17_s20   ;;  %s676_s19 = sphi %s721_s19, %s843_s19   ;;  %s672_s18 = sphi %s719_s18, %s842_s18   ;;  %s668_s17 = sphi %s717_s17, %s841_s17   ;;  %s664_s16 = sphi %s715_s16, %s840_s16   ;;  %s660_s15 = sphi %s713_s15, %s839_s15  }
   0x5   : > { %p31_p0 = scmp.ge.s32.totalorder %s29_s22, 2  ;;  %s38_s23 = sadd.s32 1, %s668_s17 }
   0x6   : > { %p45_p1 = scmp.ne.s32.totalorder %s668_s17, %s664_s16  ;;  %p46_p2 = scmp.eq.s32.totalorder %s680_s20, 0 }
   0x7   : > { %s845_s22 = smov (%p31_p0, %s29_s22), 0  ;;  %p51_p4 = scmp.ne.s32.totalorder %s664_s16, %s660_s15 }
   0x8   : > { %p749_p3 = por %p46_p2, %p45_p1  ;;  %s33_s25 = ssub.s32 %s676_s19, %s845_s22 }
   0x9   : > { %p52_p5 = scmp.eq.s32.totalorder %s513_s21, 0  ;;  %p36_p6 = scmp.eq.s32.totalorder %s33_s25, 0 }
   0xa   : > { %p541_p8 = scmp.lt.s32.totalorder %s680_s20, 2  ;;  %s173_s28 = sand.u32 1, %s668_s17  }
   0xb   : > { %p756_p7 = por %p52_p5, %p51_p4  ;;  %s527_s29 = sshll.u32 %s676_s19, 10 }
   0xc   : > { %s762_s27 = scalar_select %p36_p6, %s668_s17, %s38_s23  }
   0xd   : > { %s517_s30 = sshll.u32 %s173_s28, 6  ;;  %s185_s7 = scalar_lea.hbm %s831_s0, %s527_s29 }
   0xe   : > { %s177_s8 = scalar_lea.vmem [#allocation3], %s517_s30  ;;  %p771_p9 = pnand %p541_p8, %p749_p3 }
   0xf   : > { %s186_s9 = sshll.u32 %s177_s8, 4  ;;  %s174_s11 = scalar_lea.sflag [#allocation4], %s173_s28  ;;  %s187_s9 = int_to_ptr.vmem [resolvable:$true] %s186_s9 }
  0x10   : > { %p604_p10 = pneg %p771_p9  ;;  %s615_s12 = scalar_lea.vmem %s187_s9, 1024 }
  0x11   : > { %p616_p11 = scmp.ne.s32.totalorder %s187_s9, %s615_s12  ;;  %s682_s13 = smov [#allocation3]  }
  0x12   : > { %s620_s14 = sshll.u32 %s682_s13, 4  ;;  %s621_s14 = int_to_ptr.vmem [resolvable:$false] %s620_s14 }
  0x13   : > { %p618_p12 = pnand %p616_p11, %p604_p10  ;;  %s622_s15 = scalar_lea.vmem %s621_s14, 2048 }
  0x14   : > { %p623_p0 = scmp.lt.s32.totalorder %s187_s9, %s621_s14  ;;  %p624_p1 = scmp.lt.s32.totalorder %s622_s15, %s615_s12 }
  0x15   : > { %p619_p13 = pneg %p618_p12 }
  0x16   : > { %p625_p2 = por %p624_p1, %p623_p0 }
  0x18   : > { %p626_p3 = pnand %p625_p2, %p619_p13 }
  0x1a   : > { %629 = shalt.err (!%p626_p3)
}
  0x1b   : > { %s683_s21 = smov 128   ;;  %s684_s23 = smov 8  }
  0x1c   : > { %540 = dma.hbm_to_vmem [thread:$0]  (!%p771_p9), %s185_s7, 1024, %s187_s9, %s174_s11, %s683_s21, %s683_s21, %s684_s23  }
  0x1d   : > { %p520_p4 = scmp.ge.s32.totalorder %s680_s20, 1  ;;  %p194_p5 = scmp.lt.s32.totalorder %s680_s20, 3 }
  0x1f   : > { %p195_p6 = pnand %p520_p4, %p194_p5 }
  0x20   : > { %s200_s24 = sand.u32 (!%p195_p6), 1, %s664_s16  }
  0x21   : > { %198 = sbr.rel (%p195_p6) target bundleno = 748 (0x2ec), region = 36  ;;  %s521_s25 = sshll.u32 (!%p195_p6), %s200_s24, 6 }
  0x22   : > { %s201_s28 = scalar_lea.sflag (!%p195_p6), [#allocation4], %s200_s24  ;;  %s204_s29 = scalar_lea.vmem (!%p195_p6), [#allocation3], %s521_s25 }
  0x26   : > { %655 = dma.done.wait (%p756_p7), %s201_s28, 1024  }
  0x27   : > { %657 = vsyncadd (%p756_p7), %s201_s28, 4294966272  ;;  %v685_v0 = vmov 0.0   ;;  %vm686_vm0 = vmmov 0   ;;  %v687_v1 = vmov 0   ;;  %vm241_vm1 = vcmask 130048   ;;  %v233_v2 = vld [vmem:[%s204_s29] sm:$0xff] }
  0x28   : > { %530 = vmatprep.subr.mxu0 %v685_v0  ;;  %532 = vmatprep.mubr.msk.f32.mxu0 %vm686_vm0, %v685_v0  ;;  %v234_v3 = vld [vmem:[%s204_s29 + $0x8] sm:$0xff]  ;;  %v235_v4 = vld [vmem:[%s204_s29 + $0x10] sm:$0xff]  ;;  %v236_v5 = vld [vmem:[%s204_s29 + $0x18] sm:$0xff]  ;;  %v242_v8 = vsel %vm241_vm1, %v233_v2, 0.0  ;;  %vm286_vm2 = vcmask 1041409   ;;  %vm288_vm3 = vcmask 1042434  }
  0x29   : > { %595 = vset.pattern.permute.xlu0 %v687_v1  ;;  %v237_v6 = vld [vmem:[%s204_s29 + $0x20] sm:$0xff]  ;;  %v238_v7 = vld [vmem:[%s204_s29 + $0x28] sm:$0xff]  ;;  %v243_v9 = vsel %vm241_vm1, %v234_v3, 0.0  ;;  %v251_v10 = vsel %vm241_vm1, %v235_v4, 0.0  ;;  %v239_v11 = vld [vmem:[%s204_s29 + $0x30] sm:$0xff]  ;;  %v252_v14 = vsel %vm241_vm1, %v236_v5, 0.0 }
  0x2a   : > { %v240_v12 = vld [vmem:[%s204_s29 + $0x38] sm:$0xff]  ;;  %v244_v13 = vadd.f32 %v243_v9, %v242_v8  ;;  %v260_v15 = vsel %vm241_vm1, %v237_v6, 0.0  ;;  %v261_v16 = vsel %vm241_vm1, %v238_v7, 0.0  ;;  %v253_v17 = vadd.f32 %v252_v14, %v251_v10  ;;  %p229_p7 = scmp.lt.s32.totalorder %s672_s18, 1 }
  0x2b   : > { %v262_v18 = vadd.f32 %v261_v16, %v260_v15  ;;  %v269_v19 = vsel %vm241_vm1, %v239_v11, 0.0  ;;  %v270_v20 = vsel %vm241_vm1, %v240_v12, 0.0  ;;  %v319_v21 = vld [vmem:[%s833_s2] sm:$0xf]  ;;  %vm290_vm4 = vcmask 1043459  }
  0x2c   : > { %v245_v22 = vrot.slane %v244_v13, 4  ;;  %v271_v23 = vadd.f32 %v270_v20, %v269_v19  ;;  %322 = vperm.xlu0 %595, %v319_v21   ;;  %v254_v24 = vrot.slane %v253_v17, 4  ;;  %v404_v26 = vld [vmem:[%s834_s3] sm:$0xf]  ;;  %vm293_vm5 = vcmask 125952   ;;  %s847_s18 = smov (!%p229_p7, %s672_s18), 1 }
  0x2d   : > { %v263_v25 = vrot.slane %v262_v18, 4  ;;  %vm329_vm6 = vcmask 1043456   ;;  %v318_v51 = vld [vmem:[%s832_s1] sm:$0xf]  ;;  %vm325_vm7 = vcmask 31744   ;;  %s522_s9 = sshll.u32 %s847_s18, 2 }
  0x2e   : > { %v246_v27 = vadd.f32 %v245_v22, %v244_v13  ;;  %v272_v28 = vrot.slane %v271_v23, 4  ;;  %v255_v29 = vadd.f32 %v254_v24, %v253_v17  ;;  %s232_s12 = scalar_lea.vmem %s835_s4, %s522_s9  ;;  %vm435_vm8 = vcmask 3072  }
  0x2f   : > { %v264_v30 = vadd.f32 %v263_v25, %v262_v18 }
  0x30   : > { %v247_v31 = vrot.slane %v246_v27, 2  ;;  %v273_v32 = vadd.f32 %v272_v28, %v271_v23  ;;  %407 = vperm.xlu0 %595, %v404_v26   ;;  %v256_v33 = vrot.slane %v255_v29, 2 }
  0x31   : > { %v265_v34 = vrot.slane %v264_v30, 2 }
  0x32   : > { %v248_v35 = vadd.f32 %v247_v31, %v246_v27  ;;  %v274_v36 = vrot.slane %v273_v32, 2  ;;  %v257_v37 = vadd.f32 %v256_v33, %v255_v29 }
  0x33   : > { %v266_v38 = vadd.f32 %v265_v34, %v264_v30 }
  0x34   : > { %v249_v39 = vrot.slane %v248_v35, 1  ;;  %v275_v40 = vadd.f32 %v274_v36, %v273_v32  ;;  %v258_v41 = vrot.slane %v257_v37, 1 }
  0x35   : > { %v267_v42 = vrot.slane %v266_v38, 1 }
  0x36   : > { %v250_v43 = vadd.f32 %v249_v39, %v248_v35  ;;  %v276_v44 = vrot.slane %v275_v40, 1  ;;  %v259_v45 = vadd.f32 %v258_v41, %v257_v37 }
  0x37   : > { %v268_v46 = vadd.f32 %v267_v42, %v266_v38 }
  0x38   : > { %v277_v47 = vadd.f32 %v276_v44, %v275_v40  ;;  %v287_v48 = vsel %vm286_vm2, %v259_v45, %v250_v43 }
  0x39   : > { %v289_v49 = vsel %vm288_vm3, %v268_v46, %v287_v48 }
  0x3a   : > { %v291_v50 = vsel %vm290_vm4, %v277_v47, %v289_v49 }
  0x3b   : > { %294 = vst.msk [vmem:[#allocation2] sm:$0xf] %vm293_vm5, %v291_v50 }
  0x42   : > { %v317_v52 = vld [vmem:[#allocation2] sm:$0xf] }
  0x43   : > { %531 = vmatpush3.msk.msra.mxu0 %vm329_vm6, %v317_v52 }
  0x44   : > { %533 = vmatmul.mubr.msk.f32.vlgmr.msra.gmra.mxu0 %vm325_vm7, %v318_v51 }
  0xa7   : > { %v323_v53 = vpop.permute.xlu0 %322 }
  0xab   : > { %v408_v58 = vpop.permute.xlu0 %407 }
 0x104   : > { %v399_v54 = vpop.f32.mrf.mxu0 }
 0x105   : > { %v400_v55 = vadd.f32 %v399_v54, %v323_v53 }
 0x106   : > { %v534_v56 = vpop.f32.mrf.mxu0 }
 0x107   : > { %596 = vtanh.f32 %v400_v55 }
 0x114   : > { %v597_v57 = vpop.eup %596 }
 0x115   : > { %v410_v59 = vmul.f32 %v597_v57, %v408_v58 }
 0x117   : > { %v412_v60 = vsel %vm293_vm5, %v410_v59, 0.0 }
 0x118   : > { %v413_v61 = vrot.slane %v412_v60, 4 }
 0x11a   : > { %v414_v62 = vadd.f32 %v413_v61, %v412_v60 }
 0x11c   : > { %v415_v63 = vrot.slane %v414_v62, 2 }
 0x11e   : > { %v416_v0 = vadd.f32 %v415_v63, %v414_v62 }
 0x120   : > { %v417_v1 = vrot.slane %v416_v0, 1 }
 0x122   : > { %v418_v2 = vadd.f32 %v417_v1, %v416_v0 }
 0x124   : > { %v419_v3 = vsel %vm241_vm1, %v418_v2, -inf }
 0x125   : > { %420 = vmax.xlane.f32.xlu1 %v419_v3 }
 0x1ae   : > { %v421_v4 = vpop.xlane.xlu1 %420 }
 0x1af   : > { %v422_v5 = vsub.f32 %v418_v2, %v421_v4 }
 0x1b1   : > { %v423_v6 = vmul.f32 1.442695, %v422_v5 }
 0x1b3   : > { %598 = vpow2.f32 %v423_v6 }
 0x1c0   : > { %v599_v7 = vpop.eup %598 }
 0x1c1   : > { %v425_v8 = vsel %vm241_vm1, %v599_v7, 0.0 }
 0x1c2   : > { %426 = vadd.xlane.f32.xlu1 %v425_v8 }
 0x24b   : > { %v427_v9 = vpop.xlane.xlu1 %426 }
 0x24c   : > { %600 = vrcp.f32 %v427_v9 }
 0x259   : > { %v601_v10 = vpop.eup %600 }
 0x25a   : > { %v429_v11 = vmul.f32 %v601_v10, %v599_v7 }
 0x25c   : > { %v430_v12 = vmul.f32 %v429_v11, %v317_v52 }
 0x25e   : > { %v431_v13 = vsel %vm293_vm5, %v430_v12, 0.0 }
 0x25f   : > { %432 = vadd.xlane.f32.xlu0 %v431_v13 }
 0x2e8   : > { %v433_v14 = vpop.xlane.xlu0 %432 }
 0x2e9   : > { %v434_v15 = vmul.f32 0.0625, %v433_v14 }
 0x2eb   : > { %436 = vst.msk [vmem:[%s232_s12] sm:$0xf] %vm435_vm8, %v434_v15 }
 0x2ec PF: > { %s17_s20 = sadd.s32 1, %s680_s20   ;;  %s839_s15 = smov %s664_s16 }
 0x2ed   : > { %p14_p8 = scmp.ge.s32.totalorder %s17_s20, 4   ;;  %s840_s16 = smov %s668_s17 }
 0x2ee   : > { %s841_s17 = smov %s762_s27  ;;  %s842_s18 = smov %s676_s19 }
 0x2ef   : > { %s843_s19 = smov %s845_s22  ;;  %16 = sbr.rel (!%p14_p8) target bundleno = 4 (0x4), region = 88 }
 0x2f4   :  { %456 = vsyncpa [#allocation4], 1 }
 0x2f5   :  { %458 = vsyncpa [#allocation4 + $0x1], 1 }

</bundles_post_ra>
